<compile_context>
chip_gen: v7x
topology: tpu7x:2x2x1
jax: 0.10.0
libtpu: 0.0.40
codegen_flags: <defaults>
</compile_context>

<pallas_src>
import jax
import jax.numpy as jnp
import numpy as np
from jax.experimental import pallas as pl
from jax.experimental.pallas import tpu as pltpu


def _round_up(x, m):
    return ((x + m - 1) // m) * m


def textcnn_kernel(xw_ref, wconv_ref, bconv_ref, mask_ref, fcw_ref, fcb_ref,
                   out_ref):
    Lout_p, H3p = mask_ref.shape          # padded window count, padded 3H
    TB = out_ref.shape[0]                 # samples per grid step

    # Fused conv1/conv2/conv3: ONE MXU matmul over the pre-built im2col rows.
    #   xw (TB*Lout_p, 4H) @ w_conv (4H, H3p) -> (TB*Lout_p, H3p), f32 acc.
    y = jnp.dot(xw_ref[...], wconv_ref[...], preferred_element_type=jnp.float32)

    # bias + ReLU, then zero the invalid time positions (per-conv valid length
    # and Lout padding).  Post-ReLU activations are >= 0 and every conv group
    # has at least one valid position, so 0-masking preserves the max.
    y = jnp.maximum(y + bconv_ref[...], 0.0)
    y = y.reshape(TB, Lout_p, H3p) * mask_ref[...][None, :, :]
    feat = jnp.max(y, axis=1)                                     # (TB, H3p)

    # FC on the concatenated (lane-padded) max-pooled features -> (TB, Cp),
    # written as a full-vreg, lane-dense store.
    logits = jnp.dot(feat.astype(fcw_ref.dtype), fcw_ref[...],
                     preferred_element_type=jnp.float32) + fcb_ref[...]
    out_ref[...] = logits.astype(out_ref.dtype)


def prepare_params(params, seq_len, *, mxu_dtype=jnp.bfloat16):
    """One-time packing of the TextCNN weights for the Pallas kernel.

    Returns a dict of arrays:
      w_conv (4H, H3p)   : taps of conv1/2/3 zero-padded to K=4, concatenated,
                           output channels zero-padded to a 128 multiple.
      b_conv (1, H3p)    : concatenated conv biases (f32), zero-padded.
      mask   (Lout_p,H3p): 0/1 time-validity mask (f32), per conv group.
      fc_w   (H3p, Cp)   : fc.weight.T zero-padded (rows to H3p, cols to Cp).
      fc_b   (1, Cp)     : fc bias (f32), zero-padded.
    """
    H = params["w1"].shape[0]
    C = params["fc_b"].shape[0]
    L = int(seq_len)
    assert L >= 2, "conv3 (k=4, pad=1) needs L >= 2"

    Lout_p = _round_up(L + 1, 8)          # longest conv output, sublane-padded
    H3 = 3 * H
    H3p = _round_up(H3, 128)              # lane-dense fused conv width
    Cp = _round_up(C, 128)                # lane-dense logits width

    # Fused conv weight: rows are tap-major [k*H + c_in], columns are
    # conv-major [g*H + c_out]; taps beyond each conv's K are zero.
    def taps(w, K):                       # torch layout (C_out, C_in, K)
        wt = jnp.transpose(w, (2, 1, 0))  # -> (K, C_in, C_out)
        return jnp.pad(wt, ((0, 4 - K), (0, 0), (0, 0)))

    w_conv = jnp.concatenate([taps(params["w1"], 2),
                              taps(params["w2"], 3),
                              taps(params["w3"], 4)], axis=2)   # (4, H, 3H)
    w_conv = w_conv.reshape(4 * H, H3)
    w_conv = jnp.pad(w_conv, ((0, 0), (0, H3p - H3))).astype(mxu_dtype)

    b_conv = jnp.concatenate([params["b1"], params["b2"], params["b3"]])
    b_conv = jnp.pad(b_conv, (0, H3p - H3)).reshape(1, H3p).astype(jnp.float32)

    # Time-validity mask: conv1 (k=2) valid t < L+1, conv2 t < L,
    # conv3 t < L-1; padded output channels always invalid.
    limits = np.concatenate([np.full(H, L + 1), np.full(H, L),
                             np.full(H, L - 1),
                             np.zeros(H3p - H3)]).astype(np.int64)
    mask = (np.arange(Lout_p)[:, None] < limits[None, :]).astype(np.float32)
    mask = jnp.asarray(mask)                                     # (Lout_p, H3p)

    fc_w = jnp.pad(params["fc_w"].T,
                   ((0, H3p - H3), (0, Cp - C))).astype(mxu_dtype)
    fc_b = jnp.pad(params["fc_b"], (0, Cp - C)).reshape(1, Cp).astype(jnp.float32)

    return dict(w_conv=w_conv, b_conv=b_conv, mask=mask, fc_w=fc_w, fc_b=fc_b)


def _pick_tb(batch, lout_p, h, h3p, itemsize):
    """Default batch tile: ~1024 im2col (M) rows per grid step, >= 2 grid
    steps when the batch is large enough (v7x megacore), capped by VMEM."""
    b8 = _round_up(max(batch, 1), 8)
    tb = _round_up(max(64, -(-1024 // lout_p)), 8)          # perf target
    per_sample = (2 * lout_p * 4 * h * itemsize             # im2col dbl-buffer
                  + 2 * lout_p * h3p * 4)                    # f32 act + margin
    tb_vmem = max(8, ((12 * 1024 * 1024) // per_sample) // 8 * 8)
    tb = min(tb, tb_vmem)
    if b8 >= 16:
        tb = min(tb, _round_up(-(-b8 // 2), 8))              # keep >= 2 steps
    else:
        tb = min(tb, b8)                                     # tiny batch: 1 step
    return max(8, tb)


def textcnn_forward(x, packed, num_classes, *, tb=None):
    """x: (B, L, H) float32; packed = prepare_params(params, L).
    Returns logits (B, num_classes) float32."""
    B, L, H = x.shape
    mask = packed["mask"]
    Lout_p, H3p = mask.shape
    Cp = packed["fc_b"].shape[1]
    mxu_dtype = packed["w_conv"].dtype
    itm = jnp.dtype(mxu_dtype).itemsize
    assert L >= 2, "conv3 (k=4, pad=1) needs L >= 2"
    assert Lout_p == _round_up(L + 1, 8), \
        "packed params were prepared for a different seq_len"

    if tb is None:
        tb = _pick_tb(B, Lout_p, H, H3p, itm)
    else:
        tb = _round_up(max(int(tb), 8), 8)
    Bp = _round_up(B, tb)
    n_steps = Bp // tb

    # Wrapper-side im2col (pure layout plumbing, done by XLA outside the
    # kernel): xw[b, t, k*H + c] = x_padded[b, t + k, c], where x_padded has
    # the Conv1d left pad (one zero time step) plus right zero padding.
    x_t = jnp.pad(x.astype(mxu_dtype),
                  ((0, Bp - B), (1, Lout_p + 2 - L), (0, 0)))   # (Bp, Lout_p+3, H)
    xw = jnp.concatenate([x_t[:, k:k + Lout_p, :] for k in range(4)], axis=-1)
    xw = xw.reshape(Bp * Lout_p, 4 * H)            # lane-dense im2col rows

    cost = pl.CostEstimate(
        flops=2 * Bp * Lout_p * (4 * H) * H3p + 2 * Bp * H3p * Cp,
        transcendentals=0,
        bytes_accessed=(xw.size * itm
                        + packed["w_conv"].size * itm
                        + packed["fc_w"].size * itm
                        + mask.size * 4 + (H3p + Cp) * 4
                        + Bp * Cp * 4))

    # Explicit VMEM budget (matters once tb / H / L are scaled; v7x has only
    # 64 MiB physical VMEM with a 32 MiB scoped default).
    vmem_bytes = (2 * tb * Lout_p * 4 * H * itm        # input double-buffer
                  + 2 * tb * Lout_p * H3p * 4          # f32 conv activations
                  + 4 * H * H3p * itm + H3p * 4        # conv weights + bias
                  + Lout_p * H3p * 4                   # mask
                  + H3p * Cp * itm + Cp * 4            # fc weights + bias
                  + 2 * tb * Cp * 4)                   # output double-buffer
    vmem_limit = int(min(max(2 * vmem_bytes, 32 * 1024 * 1024),
                         64 * 1024 * 1024))

    def full(arr):
        return pl.BlockSpec(arr.shape, lambda i: (0,) * arr.ndim)

    out = pl.pallas_call(
        textcnn_kernel,
        out_shape=jax.ShapeDtypeStruct((Bp, Cp), jnp.float32),
        grid_spec=pltpu.PrefetchScalarGridSpec(
            num_scalar_prefetch=0,
            grid=(n_steps,),
            in_specs=[
                pl.BlockSpec((tb * Lout_p, 4 * H), lambda i: (i, 0)),
                full(packed["w_conv"]),
                full(packed["b_conv"]),
                full(packed["mask"]),
                full(packed["fc_w"]),
                full(packed["fc_b"]),
            ],
            out_specs=pl.BlockSpec((tb, Cp), lambda i: (i, 0)),
        ),
        compiler_params=pltpu.CompilerParams(
            dimension_semantics=("parallel",),
            vmem_limit_bytes=vmem_limit),
        cost_estimate=cost,
    )(xw, packed["w_conv"], packed["b_conv"], packed["mask"],
      packed["fc_w"], packed["fc_b"])

    return out[:B, :num_classes]


def ref_forward(x, params):
    """Pure-JAX f32 reference mirroring the PyTorch forward."""
    xc = jnp.transpose(x, (0, 2, 1))  # (B, H, L)

    def conv_relu_max(w, b, K):
        xp = jnp.pad(xc, ((0, 0), (0, 0), (1, 1)))
        L_out = xp.shape[-1] - K + 1
        out = sum(jnp.einsum("bcl,oc->bol", xp[:, :, k:k + L_out], w[:, :, k])
                  for k in range(K)) + b[None, :, None]
        out = jnp.maximum(out, 0.0)
        return jnp.max(out, axis=-1)  # (B, H)

    o1 = conv_relu_max(params["w1"], params["b1"], 2)
    o2 = conv_relu_max(params["w2"], params["b2"], 3)
    o3 = conv_relu_max(params["w3"], params["b3"], 4)
    feat = jnp.concatenate([o1, o2, o3], axis=1)  # (B, 3H)
    return feat @ params["fc_w"].T + params["fc_b"]


if __name__ == "__main__":
    # TODO(synk): nn.Dropout is defined but unused in the PyTorch forward -> no-op.
    B, L, H, C = 2, 8, 32, 4  # batch, seq, hidden_size, num_classes

    key = jax.random.PRNGKey(0)
    ks = jax.random.split(key, 10)
    params = {
        "w1": jax.random.normal(ks[0], (H, H, 2), jnp.float32) * 0.1,  # (out, in, K)
        "b1": jax.random.normal(ks[1], (H,), jnp.float32) * 0.1,
        "w2": jax.random.normal(ks[2], (H, H, 3), jnp.float32) * 0.1,
        "b2": jax.random.normal(ks[3], (H,), jnp.float32) * 0.1,
        "w3": jax.random.normal(ks[4], (H, H, 4), jnp.float32) * 0.1,
        "b3": jax.random.normal(ks[5], (H,), jnp.float32) * 0.1,
        "fc_w": jax.random.normal(ks[6], (C, 3 * H), jnp.float32) * 0.1,
        "fc_b": jax.random.normal(ks[7], (C,), jnp.float32) * 0.1,
    }
    x = jax.random.normal(ks[8], (B, L, H), jnp.float32)
    ref = jax.block_until_ready(ref_forward(x, params))

    # One-time parameter packing (hoisted out of the per-call wrapper).
    packed_bf16 = prepare_params(params, L, mxu_dtype=jnp.bfloat16)
    packed_f32 = prepare_params(params, L, mxu_dtype=jnp.float32)

    # 1) bf16 MXU inputs (v6e/v7x fast path), f32 accumulation + f32 epilogue.
    logits_bf16 = jax.block_until_ready(textcnn_forward(x, packed_bf16, C))
    assert logits_bf16.shape == (B, C)
    assert jnp.allclose(logits_bf16, ref, atol=3e-2, rtol=3e-2), (logits_bf16, ref)

    # 2) f32 MXU inputs: validates the fused-conv math independent of bf16.
    logits_f32 = jax.block_until_ready(textcnn_forward(x, packed_f32, C))
    assert jnp.allclose(logits_f32, ref, atol=1e-3, rtol=1e-3), (logits_f32, ref)

    # 3) Larger batch exercising a multi-step grid (tb=16 -> Bp=32, 2 steps,
    #    one per v7x TensorCore; single step on v5e/v6e is equally fine).
    x2 = jax.random.normal(ks[9], (20, L, H), jnp.float32)
    ref2 = jax.block_until_ready(ref_forward(x2, params))
    logits2 = jax.block_until_ready(textcnn_forward(x2, packed_bf16, C))
    assert logits2.shape == (20, C)
    assert jnp.allclose(logits2, ref2, atol=3e-2, rtol=3e-2), (logits2, ref2)

    # 4) tb is a tunable parameter: explicit override still agrees.
    logits3 = jax.block_until_ready(textcnn_forward(x2, packed_bf16, C, tb=8))
    assert jnp.allclose(logits3, ref2, atol=3e-2, rtol=3e-2), (logits3, ref2)

    print("KERNEL_OK")
</pallas_src>

<mosaic_0001>
module attributes {stable_mosaic.version = 11 : i64} {
  func.func @textcnn_kernel(%arg0: i32, %arg1: memref<128x128xbf16, #tpu.memory_space<vmem>>, %arg2: memref<128x128xbf16, #tpu.memory_space<vmem>>, %arg3: memref<1x128xf32, #tpu.memory_space<vmem>>, %arg4: memref<16x128xf32, #tpu.memory_space<vmem>>, %arg5: memref<128x128xbf16, #tpu.memory_space<vmem>>, %arg6: memref<1x128xf32, #tpu.memory_space<vmem>>, %arg7: memref<8x128xf32, #tpu.memory_space<vmem>>) attributes {dimension_semantics = [#tpu.dimension_semantics<parallel>], iteration_bounds = array<i64: 1>, scalar_prefetch = 0 : i64, scratch_operands = 0 : i64, tpu.core_type = #tpu.core_type<tc>, window_params = [{transform_indices = @transform_0, window_bounds = array<i64: 128, 128>}, {pipeline_mode = #tpu.pipeline_mode<synchronous>, transform_indices = @transform_1, window_bounds = array<i64: 128, 128>}, {pipeline_mode = #tpu.pipeline_mode<synchronous>, transform_indices = @transform_2, window_bounds = array<i64: 1, 128>}, {pipeline_mode = #tpu.pipeline_mode<synchronous>, transform_indices = @transform_3, window_bounds = array<i64: 16, 128>}, {pipeline_mode = #tpu.pipeline_mode<synchronous>, transform_indices = @transform_4, window_bounds = array<i64: 128, 128>}, {pipeline_mode = #tpu.pipeline_mode<synchronous>, transform_indices = @transform_5, window_bounds = array<i64: 1, 128>}, {transform_indices = @transform_6, window_bounds = array<i64: 8, 128>}]} {
    %c0 = arith.constant 0 : index
    %c0_0 = arith.constant 0 : index
    %0 = vector.load %arg1[%c0, %c0_0] : memref<128x128xbf16, #tpu.memory_space<vmem>>, vector<128x128xbf16>
    %c0_1 = arith.constant 0 : index
    %c0_2 = arith.constant 0 : index
    %1 = vector.load %arg2[%c0_1, %c0_2] : memref<128x128xbf16, #tpu.memory_space<vmem>>, vector<128x128xbf16>
    %cst = arith.constant dense<0.000000e+00> : vector<128x128xf32>
    %2 = tpu.matmul %0, %1, %cst {dimension_numbers = #tpu.dot_dimension_numbers<[1], [0], [0], [1], [0, 0, 1, 1], [], []>} : vector<128x128xbf16>, vector<128x128xbf16>, vector<128x128xf32> -> vector<128x128xf32>
    %c0_3 = arith.constant 0 : index
    %c0_4 = arith.constant 0 : index
    %3 = vector.load %arg3[%c0_3, %c0_4] : memref<1x128xf32, #tpu.memory_space<vmem>>, vector<1x128xf32>
    %4 = vector.broadcast %3 : vector<1x128xf32> to vector<128x128xf32>
    %5 = arith.addf %2, %4 : vector<128x128xf32>
    %cst_5 = arith.constant 0.000000e+00 : f32
    %6 = vector.broadcast %cst_5 : f32 to vector<128x128xf32>
    %7 = arith.maximumf %5, %6 : vector<128x128xf32>
    %8 = vector.shape_cast %7 : vector<128x128xf32> to vector<8x16x128xf32>
    %c0_6 = arith.constant 0 : index
    %c0_7 = arith.constant 0 : index
    %9 = vector.load %arg4[%c0_6, %c0_7] : memref<16x128xf32, #tpu.memory_space<vmem>>, vector<16x128xf32>
    %10 = vector.shape_cast %9 : vector<16x128xf32> to vector<1x16x128xf32>
    %11 = vector.broadcast %10 : vector<1x16x128xf32> to vector<8x16x128xf32>
    %12 = arith.mulf %8, %11 : vector<8x16x128xf32>
    %cst_8 = arith.constant dense<0xFF800000> : vector<8x128xf32>
    %13 = vector.multi_reduction <maximumf>, %12, %cst_8 [1] : vector<8x16x128xf32> to vector<8x128xf32>
    %14 = arith.truncf %13 : vector<8x128xf32> to vector<8x128xbf16>
    %c0_9 = arith.constant 0 : index
    %c0_10 = arith.constant 0 : index
    %15 = vector.load %arg5[%c0_9, %c0_10] : memref<128x128xbf16, #tpu.memory_space<vmem>>, vector<128x128xbf16>
    %cst_11 = arith.constant dense<0.000000e+00> : vector<8x128xf32>
    %16 = tpu.matmul %14, %15, %cst_11 {dimension_numbers = #tpu.dot_dimension_numbers<[1], [0], [0], [1], [0, 0, 1, 1], [], []>} : vector<8x128xbf16>, vector<128x128xbf16>, vector<8x128xf32> -> vector<8x128xf32>
    %c0_12 = arith.constant 0 : index
    %c0_13 = arith.constant 0 : index
    %17 = vector.load %arg6[%c0_12, %c0_13] : memref<1x128xf32, #tpu.memory_space<vmem>>, vector<1x128xf32>
    %18 = vector.broadcast %17 : vector<1x128xf32> to vector<8x128xf32>
    %19 = arith.addf %16, %18 : vector<8x128xf32>
    %c0_14 = arith.constant 0 : index
    %c0_15 = arith.constant 0 : index
    %20 = vector.load %arg7[%c0_14, %c0_15] : memref<8x128xf32, #tpu.memory_space<vmem>>, vector<8x128xf32>
    tpu.vector_store %arg7[%c0_14, %c0_15], %19 {strides = array<i32>} : memref<8x128xf32, #tpu.memory_space<vmem>>, vector<8x128xf32>,
    return
  }
  func.func @transform_0(%arg0: i32) -> (i32, i32) {
    %c0_i32 = arith.constant 0 : i32
    %c0_i32_0 = arith.constant 0 : i32
    return %arg0, %c0_i32 : i32, i32
  }
  func.func @transform_1(%arg0: i32) -> (i32, i32) {
    %c0_i32 = arith.constant 0 : i32
    %c0_i32_0 = arith.constant 0 : i32
    %c0_i32_1 = arith.constant 0 : i32
    return %c0_i32, %c0_i32_0 : i32, i32
  }
  func.func @transform_2(%arg0: i32) -> (i32, i32) {
    %c0_i32 = arith.constant 0 : i32
    %c0_i32_0 = arith.constant 0 : i32
    %c0_i32_1 = arith.constant 0 : i32
    return %c0_i32, %c0_i32_0 : i32, i32
  }
  func.func @transform_3(%arg0: i32) -> (i32, i32) {
    %c0_i32 = arith.constant 0 : i32
    %c0_i32_0 = arith.constant 0 : i32
    %c0_i32_1 = arith.constant 0 : i32
    return %c0_i32, %c0_i32_0 : i32, i32
  }
  func.func @transform_4(%arg0: i32) -> (i32, i32) {
    %c0_i32 = arith.constant 0 : i32
    %c0_i32_0 = arith.constant 0 : i32
    %c0_i32_1 = arith.constant 0 : i32
    return %c0_i32, %c0_i32_0 : i32, i32
  }
  func.func @transform_5(%arg0: i32) -> (i32, i32) {
    %c0_i32 = arith.constant 0 : i32
    %c0_i32_0 = arith.constant 0 : i32
    %c0_i32_1 = arith.constant 0 : i32
    return %c0_i32, %c0_i32_0 : i32, i32
  }
  func.func @transform_6(%arg0: i32) -> (i32, i32) {
    %c0_i32 = arith.constant 0 : i32
    %c0_i32_0 = arith.constant 0 : i32
    return %arg0, %c0_i32 : i32, i32
  }
}

</mosaic_0001>

<bundles_post_ra>
// kernel: tpu_custom_call.1
= control target key start
LH: loop header
LB: loop body
LE: loop exit
PB: predicated region body
PF: predicated region fallthrough
CT: control target
= control target key end

     0   :  { %11 = vsyncpa [#allocation3], 0  ;;  %s994_s0 = inlined_call_operand.hbm [shape: bf16[128,128], index: 0, kind: input, shape index: {}]   ;;  %s995_s1 = inlined_call_operand.hbm [shape: bf16[128,128], index: 1, kind: input, shape index: {}]   ;;  %s996_s2 = inlined_call_operand.vmem [shape: f32[1,128], index: 2, kind: input, shape index: {}]   ;;  %s997_s3 = inlined_call_operand.hbm [shape: f32[16,128], index: 3, kind: input, shape index: {}]   ;;  %s998_s4 = inlined_call_operand.hbm [shape: bf16[128,128], index: 4, kind: input, shape index: {}]   ;;  %s999_s5 = inlined_call_operand.vmem [shape: f32[1,128], index: 5, kind: input, shape index: {}]   ;;  %s1000_s6 = inlined_call_operand.hbm [shape: f32[8,128], index: 6, kind: output, shape index: {}]  }
   0x1   :  { %12 = vsyncpa [#allocation6], 0 }
   0x2   :  { %13 = vsyncpa [#allocation9], 0 }
   0x3   :  { %14 = vsyncpa [#allocation4], 0  ;;  %s827_s21 = smov [#allocation5]   ;;  %s828_s23 = smov [#allocation2]  }
   0x4   :  { %s32_s22 = sshll.u32 %s827_s21, 4  ;;  %s20_s24 = sshll.u32 %s828_s23, 4  ;;  %s33_s22 = int_to_ptr.vmem [resolvable:$true] %s32_s22  ;;  %s873_s24 = int_to_ptr.vmem [resolvable:$true] %s20_s24 }
   0x5   :  { %s709_s27 = scalar_lea.hbm %s995_s1, 1024 }
   0x6   :  { %p710_p0 = scmp.ne.s32.totalorder %s995_s1, %s709_s27  ;;  %p713_p1 = scmp.lt.u32.totalorder %s709_s27, %s995_s1 }
   0x8   :  { %p715_p2 = pnand %p713_p1, %p710_p0 }
   0xa   :  { %718 = shalt.err (!%p715_p2)
}
   0xb   :  { %s719_s8 = scalar_lea.vmem %s33_s22, 1024  ;;  %p724_p4 = scmp.lt.s32.totalorder %s33_s22, %s33_s22 }
   0xc   :  { %p720_p3 = scmp.ne.s32.totalorder %s33_s22, %s719_s8  ;;  %p725_p5 = scmp.lt.s32.totalorder %s719_s8, %s719_s8 }
   0xe   :  { %p726_p6 = por %p725_p5, %p724_p4 }
  0x10   :  { %p727_p7 = pnand %p726_p6, %p720_p3 }
  0x12   :  { %730 = shalt.err (!%p727_p7)
}
  0x13   :  { %s829_s9 = smov 64   ;;  %s830_s10 = smov 4  }
  0x14   :  { %38 = dma.hbm_to_vmem [thread:$0]  %s995_s1, 1024, %s33_s22, [#allocation6], %s829_s9, %s829_s9, %s830_s10  }
  0x15   :  { %s731_s15 = scalar_lea.hbm %s994_s0, 1024 }
  0x16   :  { %p732_p8 = scmp.ne.s32.totalorder %s994_s0, %s731_s15  ;;  %p735_p9 = scmp.lt.u32.totalorder %s731_s15, %s994_s0 }
  0x18   :  { %p737_p10 = pnand %p735_p9, %p732_p8 }
  0x1a   :  { %740 = shalt.err (!%p737_p10)
}
  0x1b   :  { %s741_s20 = scalar_lea.vmem %s873_s24, 1024  ;;  %p746_p12 = scmp.lt.s32.totalorder %s873_s24, %s873_s24 }
  0x1c   :  { %p742_p11 = scmp.ne.s32.totalorder %s873_s24, %s741_s20  ;;  %p747_p13 = scmp.lt.s32.totalorder %s741_s20, %s741_s20 }
  0x1e   :  { %p748_p0 = por %p747_p13, %p746_p12 }
  0x20   :  { %p749_p1 = pnand %p748_p0, %p742_p11 }
  0x22   :  { %752 = shalt.err (!%p749_p1)
}
  0x23   :  { %26 = dma.hbm_to_vmem [thread:$0]  %s994_s0, 1024, %s873_s24, [#allocation3], %s829_s9, %s829_s9, %s830_s10  }
  0x24   :  { %s831_s22 = smov [#allocation7]   ;;  %s753_s27 = scalar_lea.hbm %s997_s3, 256 }
  0x25   :  { %s46_s23 = sshll.u32 %s831_s22, 4  ;;  %p754_p2 = scmp.ne.s32.totalorder %s997_s3, %s753_s27  ;;  %s47_s23 = int_to_ptr.vmem [resolvable:$true] %s46_s23 }
  0x26   :  { %p757_p3 = scmp.lt.u32.totalorder %s753_s27, %s997_s3 }
  0x28   :  { %p759_p4 = pnand %p757_p3, %p754_p2 }
  0x2a   :  { %762 = shalt.err (!%p759_p4)
}
  0x2b   :  { %s763_s8 = scalar_lea.vmem %s47_s23, 256  ;;  %p768_p6 = scmp.lt.s32.totalorder %s47_s23, %s47_s23 }
  0x2c   :  { %p764_p5 = scmp.ne.s32.totalorder %s47_s23, %s763_s8  ;;  %p769_p7 = scmp.lt.s32.totalorder %s763_s8, %s763_s8 }
  0x2e   :  { %p770_p8 = por %p769_p7, %p768_p6 }
  0x30   :  { %p771_p9 = pnand %p770_p8, %p764_p5 }
  0x32   :  { %774 = shalt.err (!%p771_p9)
}
  0x33   :  { %s832_s0 = smov 128   ;;  %s833_s24 = smov 8  }
  0x34   :  { %52 = dma.hbm_to_vmem [thread:$0]  %s997_s3, 256, %s47_s23, [#allocation6], %s832_s0, %s832_s0, %s833_s24  }
  0x35   :  { %s834_s13 = smov [#allocation8]   ;;  %s775_s17 = scalar_lea.hbm %s998_s4, 1024 }
  0x36   :  { %s58_s14 = sshll.u32 %s834_s13, 4  ;;  %p776_p10 = scmp.ne.s32.totalorder %s998_s4, %s775_s17  ;;  %s59_s14 = int_to_ptr.vmem [resolvable:$true] %s58_s14 }
  0x37   :  { %p779_p11 = scmp.lt.u32.totalorder %s775_s17, %s998_s4 }
  0x39   :  { %p781_p12 = pnand %p779_p11, %p776_p10 }
  0x3b   :  { %784 = shalt.err (!%p781_p12)
}
  0x3c   :  { %s785_s21 = scalar_lea.vmem %s59_s14, 1024  ;;  %p790_p0 = scmp.lt.s32.totalorder %s59_s14, %s59_s14 }
  0x3d   :  { %p786_p13 = scmp.ne.s32.totalorder %s59_s14, %s785_s21  ;;  %p791_p1 = scmp.lt.s32.totalorder %s785_s21, %s785_s21 }
  0x3f   :  { %p792_p2 = por %p791_p1, %p790_p0 }
  0x41   :  { %p793_p3 = pnand %p792_p2, %p786_p13 }
  0x43   :  { %796 = shalt.err (!%p793_p3)
}
  0x44   :  { %64 = dma.hbm_to_vmem [thread:$0]  %s998_s4, 1024, %s59_s14, [#allocation9], %s829_s9, %s829_s9, %s830_s10  }
  0x45   :  { %819 = dma.done.wait [#allocation3], 1024  }
  0x46   :  { %820 = vsyncadd [#allocation3], 4294966272 }
  0x47   :  { %821 = dma.done.wait [#allocation6], 1280  }
  0x48   :  { %822 = vsyncadd [#allocation6], 4294966016 }
  0x49   :  { %823 = dma.done.wait [#allocation9], 1024  }
  0x4a   :  { %824 = vsyncadd [#allocation9], 4294966272  ;;  %v685_v0 = vld [vmem:[#allocation5] sm:$0xff]   ;;  %v686_v1 = vld [vmem:[#allocation5 + $0x8] sm:$0xff]   ;;  %v835_v17 = vmov 0.0   ;;  %vm836_vm0 = vmmov 0  }
  0x4b   :  { %622 = vmatprep.subr.bf16.mxu0 %v685_v0  ;;  %v687_v2 = vld [vmem:[#allocation5 + $0x10] sm:$0xff]   ;;  %v688_v3 = vld [vmem:[#allocation5 + $0x18] sm:$0xff]   ;;  %v693_v4 = vld [vmem:[#allocation2] sm:$0xff]   ;;  %654 = vmatprep.subr.bf16.mxu1 %v835_v17  ;;  %vm449_vm1 = vcmask 1041409   ;;  %vm451_vm2 = vcmask 1042434   ;;  %vm453_vm3 = vcmask 1043459  }
  0x4c   :  { %623 = vmatpush3.bf16.msra.mxu0 %v685_v0  ;;  %638 = vmatprep.mubr.bf16.mxu0 %v693_v4  ;;  %v689_v5 = vld [vmem:[#allocation5 + $0x20] sm:$0xff]   ;;  %v690_v6 = vld [vmem:[#allocation5 + $0x28] sm:$0xff]   ;;  %v691_v7 = vld [vmem:[#allocation5 + $0x30] sm:$0xff]   ;;  %vm455_vm4 = vcmask 1044484   ;;  %vm457_vm5 = vcmask 1045509   ;;  %vm459_vm6 = vcmask 1046534  }
  0x4d   :  { %624 = vmatprep.subr.bf16.mxu0 %v686_v1  ;;  %v692_v8 = vld [vmem:[#allocation5 + $0x38] sm:$0xff]   ;;  %v694_v9 = vld [vmem:[#allocation2 + $0x8] sm:$0xff]   ;;  %v695_v10 = vld [vmem:[#allocation2 + $0x10] sm:$0xff]   ;;  %670 = vmatprep.mubr.msk.bf16.mxu1 %vm836_vm0, %v835_v17  ;;  %vm461_vm7 = vcmask 1047559   ;;  %s837_s23 = smov [#allocation10]  }
  0x4e   :  { %v696_v11 = vld [vmem:[#allocation2 + $0x18] sm:$0xff]   ;;  %v697_v12 = vld [vmem:[#allocation2 + $0x20] sm:$0xff]   ;;  %v698_v13 = vld [vmem:[#allocation2 + $0x28] sm:$0xff]   ;;  %s560_s25 = sshll.u32 %s837_s23, 4  ;;  %s561_s25 = int_to_ptr.vmem [resolvable:$true] %s560_s25 }
  0x4f   :  { %v699_v14 = vld [vmem:[#allocation2 + $0x30] sm:$0xff]   ;;  %v700_v15 = vld [vmem:[#allocation2 + $0x38] sm:$0xff]   ;;  %v703_v19 = vld [vmem:[#allocation8 + $0x10] sm:$0xff]   ;;  %s797_s26 = scalar_lea.vmem %s561_s25, 128  ;;  %p802_p5 = scmp.lt.s32.totalorder %s561_s25, %s561_s25 }
  0x50   :  { %625 = vmatpush3.bf16.msra.mxu0 %v686_v1  ;;  %v701_v16 = vld [vmem:[#allocation8] sm:$0xff]   ;;  %v702_v18 = vld [vmem:[#allocation8 + $0x8] sm:$0xff]   ;;  %v704_v20 = vld [vmem:[#allocation8 + $0x18] sm:$0xff]   ;;  %p798_p4 = scmp.ne.s32.totalorder %s561_s25, %s797_s26  ;;  %p803_p6 = scmp.lt.s32.totalorder %s797_s26, %s797_s26 }
  0x51   :  { %626 = vmatprep.subr.bf16.mxu0 %v687_v2  ;;  %655 = vmatpush3.bf16.msra.mxu1 %v701_v16  ;;  %v705_v21 = vld [vmem:[#allocation8 + $0x20] sm:$0xff]   ;;  %v706_v22 = vld [vmem:[#allocation8 + $0x28] sm:$0xff]   ;;  %v707_v23 = vld [vmem:[#allocation8 + $0x30] sm:$0xff]  }
  0x52   :  { %656 = vmatprep.subr.bf16.mxu1 %v835_v17  ;;  %v708_v24 = vld [vmem:[#allocation8 + $0x38] sm:$0xff]   ;;  %v940_v25 = vld [vmem:[%s996_s2] ss:$0 sm:$0xff]  ;;  %p804_p7 = por %p803_p6, %p802_p5 }
  0x53   :  { %v945_v34 = vld [vmem:[#allocation7] sm:$0xff]  ;;  %v947_v36 = vld [vmem:[#allocation7 + $0x8] sm:$0xff] }
  0x54   :  { %627 = vmatpush3.bf16.msra.mxu0 %v687_v2  ;;  %p805_p8 = pnand %p804_p7, %p798_p4 }
  0x55   :  { %628 = vmatprep.subr.bf16.mxu0 %v688_v3  ;;  %657 = vmatpush3.bf16.msra.mxu1 %v702_v18 }
  0x56   :  { %658 = vmatprep.subr.bf16.mxu1 %v835_v17 }
  0x58   :  { %629 = vmatpush3.bf16.msra.mxu0 %v688_v3 }
  0x59   :  { %630 = vmatprep.subr.bf16.mxu0 %v689_v5  ;;  %659 = vmatpush3.bf16.msra.mxu1 %v703_v19 }
  0x5a   :  { %660 = vmatprep.subr.bf16.mxu1 %v835_v17 }
  0x5c   :  { %631 = vmatpush3.bf16.msra.mxu0 %v689_v5 }
  0x5d   :  { %632 = vmatprep.subr.bf16.mxu0 %v690_v6  ;;  %661 = vmatpush3.bf16.msra.mxu1 %v704_v20 }
  0x5e   :  { %662 = vmatprep.subr.bf16.mxu1 %v835_v17 }
  0x60   :  { %633 = vmatpush3.bf16.msra.mxu0 %v690_v6 }
  0x61   :  { %634 = vmatprep.subr.bf16.mxu0 %v691_v7  ;;  %663 = vmatpush3.bf16.msra.mxu1 %v705_v21 }
  0x62   :  { %664 = vmatprep.subr.bf16.mxu1 %v835_v17 }
  0x64   :  { %635 = vmatpush3.bf16.msra.mxu0 %v691_v7 }
  0x65   :  { %636 = vmatprep.subr.bf16.mxu0 %v692_v8  ;;  %665 = vmatpush3.bf16.msra.mxu1 %v706_v22 }
  0x66   :  { %666 = vmatprep.subr.bf16.mxu1 %v835_v17 }
  0x68   :  { %637 = vmatpush3.bf16.msra.mxu0 %v692_v8 }
  0x69   :  { %667 = vmatpush3.bf16.msra.mxu1 %v707_v23 }
  0x6a   :  { %668 = vmatprep.subr.bf16.mxu1 %v835_v17 }
  0x6b   :  { %639 = vmatmul.mubr.bf16.vlgmr.msra.gmra.mrb[0].mxu0 %v694_v9 }
  0x6c   :  { %642 = vmatprep.mubr.bf16.mxu0 %v695_v10 }
  0x6d   :  { %669 = vmatpush3.bf16.msra.mxu1 %v708_v24 }
  0x73   :  { %643 = vmatmul.mubr.bf16.gmra.mrb[4].mxu0 %v696_v11 }
  0x74   :  { %646 = vmatprep.mubr.bf16.mxu0 %v697_v12 }
  0x7b   :  { %647 = vmatmul.mubr.bf16.gmra.mrb[8].mxu0 %v698_v13 }
  0x7c   :  { %650 = vmatprep.mubr.bf16.mxu0 %v699_v14 }
  0x83   :  { %651 = vmatmul.mubr.bf16.gmra.mrb[12].mxu0 %v700_v15 }
 0x13e   :  { %v640_v26 = vpop.f32.mrb[0].mxu0 }
 0x13f   :  { %v258_v27 = vadd.f32 %v640_v26, %v940_v25  ;;  %v249_v28 = vpop.f32.mrb[1].mxu0 }
 0x140   :  { %v250_v29 = vadd.f32 %v940_v25, %v249_v28  ;;  %v641_v30 = vpop.f32.mrb[2].mxu0 }
 0x141   :  { %v314_v31 = vmax.f32 %v258_v27, 0.0  ;;  %v261_v32 = vadd.f32 %v641_v30, %v940_v25  ;;  %v252_v33 = vpop.f32.mrb[3].mxu0 }
 0x142   :  { %v312_v35 = vmax.f32 %v250_v29, 0.0  ;;  %v253_v37 = vadd.f32 %v940_v25, %v252_v33 }
 0x143   :  { %v315_v38 = vmax.f32 %v261_v32, 0.0  ;;  %v332_v40 = vmul.f32 %v945_v34, %v314_v31 }
 0x144   :  { %v313_v39 = vmax.f32 %v253_v37, 0.0  ;;  %v330_v42 = vmul.f32 %v945_v34, %v312_v35 }
 0x145   :  { %v333_v41 = vmul.f32 %v947_v36, %v315_v38 }
 0x146   :  { %v331_v43 = vmul.f32 %v947_v36, %v313_v39  ;;  %v644_v44 = vpop.f32.mrb[4].mxu0 }
 0x147   :  { %v353_v45 = vmax.f32 %v332_v40, %v333_v41  ;;  %v274_v46 = vadd.f32 %v644_v44, %v940_v25  ;;  %v265_v47 = vpop.f32.mrb[5].mxu0 }
 0x148   :  { %v346_v48 = vmax.f32 %v330_v42, %v331_v43  ;;  %v266_v49 = vadd.f32 %v940_v25, %v265_v47  ;;  %v645_v50 = vpop.f32.mrb[6].mxu0 }
 0x149   :  { %v354_v51 = vrot.slane %v353_v45, 4  ;;  %v318_v52 = vmax.f32 %v274_v46, 0.0  ;;  %v277_v53 = vadd.f32 %v645_v50, %v940_v25  ;;  %v268_v54 = vpop.f32.mrb[7].mxu0 }
 0x14a   :  { %v347_v55 = vrot.slane %v346_v48, 4  ;;  %v316_v56 = vmax.f32 %v266_v49, 0.0  ;;  %v269_v57 = vadd.f32 %v940_v25, %v268_v54 }
 0x14b   :  { %v355_v58 = vmax.f32 %v353_v45, %v354_v51  ;;  %v319_v59 = vmax.f32 %v277_v53, 0.0  ;;  %v336_v63 = vmul.f32 %v945_v34, %v318_v52 }
 0x14c   :  { %v348_v60 = vmax.f32 %v346_v48, %v347_v55  ;;  %v317_v61 = vmax.f32 %v269_v57, 0.0  ;;  %v334_v2 = vmul.f32 %v945_v34, %v316_v56 }
 0x14d   :  { %v356_v62 = vrot.slane %v355_v58, 2  ;;  %v337_v0 = vmul.f32 %v947_v36, %v319_v59 }
 0x14e   :  { %v349_v1 = vrot.slane %v348_v60, 2  ;;  %v335_v3 = vmul.f32 %v947_v36, %v317_v61  ;;  %v648_v4 = vpop.f32.mrb[8].mxu0 }
 0x14f   :  { %v357_v5 = vmax.f32 %v355_v58, %v356_v62  ;;  %v367_v6 = vmax.f32 %v336_v63, %v337_v0  ;;  %v290_v7 = vadd.f32 %v648_v4, %v940_v25  ;;  %v281_v8 = vpop.f32.mrb[9].mxu0 }
 0x150   :  { %v350_v9 = vmax.f32 %v348_v60, %v349_v1  ;;  %v360_v10 = vmax.f32 %v334_v2, %v335_v3  ;;  %v282_v11 = vadd.f32 %v940_v25, %v281_v8  ;;  %v649_v12 = vpop.f32.mrb[10].mxu0 }
 0x151   :  { %v358_v13 = vrot.slane %v357_v5, 1  ;;  %v368_v14 = vrot.slane %v367_v6, 4  ;;  %v322_v15 = vmax.f32 %v290_v7, 0.0  ;;  %v293_v16 = vadd.f32 %v649_v12, %v940_v25  ;;  %v284_v17 = vpop.f32.mrb[11].mxu0 }
 0x152   :  { %v351_v18 = vrot.slane %v350_v9, 1  ;;  %v361_v19 = vrot.slane %v360_v10, 4  ;;  %v320_v20 = vmax.f32 %v282_v11, 0.0  ;;  %v285_v21 = vadd.f32 %v940_v25, %v284_v17 }
 0x153   :  { %v359_v22 = vmax.f32 %v357_v5, %v358_v13  ;;  %v369_v23 = vmax.f32 %v367_v6, %v368_v14  ;;  %v323_v24 = vmax.f32 %v293_v16, 0.0  ;;  %v340_v31 = vmul.f32 %v945_v34, %v322_v15 }
 0x154   :  { %v352_v26 = vmax.f32 %v350_v9, %v351_v18  ;;  %v362_v27 = vmax.f32 %v360_v10, %v361_v19  ;;  %v321_v28 = vmax.f32 %v285_v21, 0.0  ;;  %v338_v37 = vmul.f32 %v945_v34, %v320_v20 }
 0x155   :  { %v403_v29 = vpack.c.bf16 %v359_v22, %v359_v22  ;;  %v370_v30 = vrot.slane %v369_v23, 2  ;;  %v341_v32 = vmul.f32 %v947_v36, %v323_v24 }
 0x156   :  { %v402_v33 = vpack.c.bf16 %v352_v26, %v352_v26  ;;  %v363_v35 = vrot.slane %v362_v27, 2  ;;  %v339_v38 = vmul.f32 %v947_v36, %v321_v28  ;;  %v652_v39 = vpop.f32.mrb[12].mxu0 }
 0x157   :  { %v442_v40 = vunpack.c.l.b16 %v403_v29  ;;  %v371_v41 = vmax.f32 %v369_v23, %v370_v30  ;;  %v381_v42 = vmax.f32 %v340_v31, %v341_v32  ;;  %v306_v43 = vadd.f32 %v652_v39, %v940_v25  ;;  %v297_v44 = vpop.f32.mrb[13].mxu0 }
 0x158   :  { %v441_v45 = vunpack.c.l.b16 %v402_v33  ;;  %v364_v46 = vmax.f32 %v362_v27, %v363_v35  ;;  %v374_v47 = vmax.f32 %v338_v37, %v339_v38  ;;  %v298_v48 = vadd.f32 %v940_v25, %v297_v44  ;;  %v653_v49 = vpop.f32.mrb[14].mxu0 }
 0x159   :  { %v372_v50 = vrot.slane %v371_v41, 1  ;;  %v382_v51 = vrot.slane %v381_v42, 4  ;;  %v326_v52 = vmax.f32 %v306_v43, 0.0  ;;  %v309_v53 = vadd.f32 %v653_v49, %v940_v25  ;;  %v300_v54 = vpop.f32.mrb[15].mxu0 }
 0x15a   :  { %v450_v55 = vsel %vm449_vm1, %v442_v40, %v441_v45  ;;  %v365_v56 = vrot.slane %v364_v46, 1  ;;  %v375_v57 = vrot.slane %v374_v47, 4  ;;  %v324_v63 = vmax.f32 %v298_v48, 0.0 }
 0x15b   :  { %v373_v58 = vmax.f32 %v371_v41, %v372_v50  ;;  %v383_v59 = vmax.f32 %v381_v42, %v382_v51  ;;  %v327_v60 = vmax.f32 %v309_v53, 0.0  ;;  %v301_v0 = vadd.f32 %v940_v25, %v300_v54 }
 0x15c   :  { %v366_v61 = vmax.f32 %v364_v46, %v365_v56  ;;  %v376_v62 = vmax.f32 %v374_v47, %v375_v57  ;;  %v344_v3 = vmul.f32 %v945_v34, %v326_v52  ;;  %v342_v12 = vmul.f32 %v945_v34, %v324_v63  ;;  %v588_v47 = vld [vmem:[%s999_s5] ss:$0 sm:$0xff] }
 0x15d   :  { %v405_v1 = vpack.c.bf16 %v373_v58, %v373_v58  ;;  %v384_v2 = vrot.slane %v383_v59, 2  ;;  %v345_v4 = vmul.f32 %v947_v36, %v327_v60  ;;  %v325_v7 = vmax.f32 %v301_v0, 0.0 }
 0x15e   :  { %v404_v5 = vpack.c.bf16 %v366_v61, %v366_v61  ;;  %v377_v6 = vrot.slane %v376_v62, 2 }
 0x15f   :  { %v385_v8 = vmax.f32 %v383_v59, %v384_v2  ;;  %v395_v9 = vmax.f32 %v344_v3, %v345_v4  ;;  %v343_v13 = vmul.f32 %v947_v36, %v325_v7  ;;  %v444_v25 = vunpack.c.l.b16 %v405_v1 }
 0x160   :  { %v443_v10 = vunpack.c.l.b16 %v404_v5  ;;  %v378_v11 = vmax.f32 %v376_v62, %v377_v6 }
 0x161   :  { %v386_v14 = vrot.slane %v385_v8, 1  ;;  %v396_v15 = vrot.slane %v395_v9, 4  ;;  %v388_v17 = vmax.f32 %v342_v12, %v343_v13 }
 0x162   :  { %v379_v16 = vrot.slane %v378_v11, 1  ;;  %v452_v18 = vsel %vm451_vm2, %v443_v10, %v450_v55 }
 0x163   :  { %v387_v19 = vmax.f32 %v385_v8, %v386_v14  ;;  %v397_v20 = vmax.f32 %v395_v9, %v396_v15  ;;  %v454_v21 = vsel %vm453_vm3, %v444_v25, %v452_v18  ;;  %v389_v23 = vrot.slane %v388_v17, 4 }
 0x164   :  { %v380_v22 = vmax.f32 %v378_v11, %v379_v16 }
 0x165   :  { %v407_v24 = vpack.c.bf16 %v387_v19, %v387_v19  ;;  %v398_v26 = vrot.slane %v397_v20, 2  ;;  %v390_v28 = vmax.f32 %v388_v17, %v389_v23 }
 0x166   :  { %v406_v27 = vpack.c.bf16 %v380_v22, %v380_v22 }
 0x167   :  { %v399_v29 = vmax.f32 %v397_v20, %v398_v26  ;;  %v391_v30 = vrot.slane %v390_v28, 2  ;;  %v446_v36 = vunpack.c.l.b16 %v407_v24 }
 0x168   :  { %v445_v34 = vunpack.c.l.b16 %v406_v27 }
 0x169   :  { %v400_v31 = vrot.slane %v399_v29, 1  ;;  %v392_v32 = vmax.f32 %v390_v28, %v391_v30 }
 0x16a   :  { %v456_v33 = vsel %vm455_vm4, %v445_v34, %v454_v21 }
 0x16b   :  { %v401_v35 = vmax.f32 %v399_v29, %v400_v31  ;;  %v458_v37 = vsel %vm457_vm5, %v446_v36, %v456_v33  ;;  %v393_v38 = vrot.slane %v392_v32, 1 }
 0x16d   :  { %v394_v39 = vmax.f32 %v392_v32, %v393_v38  ;;  %v409_v40 = vpack.c.bf16 %v401_v35, %v401_v35 }
 0x16f   :  { %v408_v41 = vpack.c.bf16 %v394_v39, %v394_v39  ;;  %v448_v43 = vunpack.c.l.b16 %v409_v40 }
 0x171   :  { %v447_v42 = vunpack.c.l.b16 %v408_v41 }
 0x173   :  { %v460_v44 = vsel %vm459_vm6, %v447_v42, %v458_v37 }
 0x174   :  { %v462_v45 = vsel %vm461_vm7, %v448_v43, %v460_v44 }
 0x175   :  { %v463_v46 = vpack.c.b16 %v462_v45, %v462_v45 }
 0x177   :  { %671 = vmatmul.mubr.bf16.vlgmr.msra.gmra.mrb[0].mxu1 %v463_v46 }
 0x24a   :  { %v547_v48 = vpop.f32.mrb[0].mxu1 }
 0x24b   :  { %v548_v49 = vadd.f32 %v588_v47, %v547_v48  ;;  %v672_v50 = vpop.f32.mrb[1].mxu1 }
 0x24c   :  { %v550_v51 = vpop.f32.mrb[2].mxu1 }
 0x24d   :  { %553 = vst [vmem:[#allocation10] sm:$0xff] %v548_v49  ;;  %v673_v52 = vpop.f32.mrb[3].mxu1 }
 0x24e   :  { %808 = shalt.err (!%p805_p8)
}
 0x24f   :  { %s809_s5 = scalar_lea.hbm %s1000_s6, 128 }
 0x250   :  { %p810_p9 = scmp.ne.s32.totalorder %s1000_s6, %s809_s5  ;;  %p813_p10 = scmp.lt.u32.totalorder %s809_s5, %s1000_s6 }
 0x252   :  { %p815_p11 = pnand %p813_p10, %p810_p9 }
 0x254   :  { %818 = shalt.err (!%p815_p11)
}
 0x255   :  { %563 = dma.vmem_to_hbm [thread:$0]  %s561_s25, 128, %s1000_s6, [#allocation4]  }
 0x256   :  { %825 = dma.done.wait [#allocation4], 128  }
 0x257   :  { %826 = vsyncadd [#allocation4], 4294967168 }
 0x258   :  { %567 = vsyncpa [#allocation3], 1 }
 0x259   :  { %568 = vsyncpa [#allocation6], 1 }
 0x25a   :  { %569 = vsyncpa [#allocation9], 1 }
 0x25b   :  { %570 = vsyncpa [#allocation4], 1 }

</bundles_post_ra>
